<compile_context>
chip_gen: v7x
topology: tpu7x:2x2x1
jax: 0.10.0
libtpu: 0.0.40
codegen_flags: <defaults>
</compile_context>

<pallas_src>
import functools

import jax
import jax.numpy as jnp
from jax import lax
from jax.experimental import pallas as pl
from jax.experimental.pallas import tpu as pltpu

_MiB = 1024 * 1024


# ---------------------------------------------------------------------------
# Tiling helpers
# ---------------------------------------------------------------------------
def _round_up(x, m):
    return ((x + m - 1) // m) * m


def _pick_c_chunk(c):
    """Channel chunk for in-kernel streaming (bounds vreg pressure)."""
    if c <= 64:
        return c
    for cc in (64, 32, 16, 8):
        if c % cc == 0:
            return cc
    return c


def _pick_hw_tile_gem(hw, c, itemsize):
    """Largest 128-multiple lane tile fitting 2x input block + f32 accumulator."""
    hw_ceil = _round_up(hw, 128)
    for t in (2048, 1024, 512, 256, 128):
        if t <= hw_ceil and (2 * c * t * itemsize + c * t * 4) <= 24 * _MiB:
            return t
    return 128


def _pick_hw_tile_l2n(hw, c, itemsize):
    """Largest 128-multiple lane tile fitting 2x input + 2x output blocks."""
    hw_ceil = _round_up(hw, 128)
    for t in (1024, 512, 256, 128):
        if t <= hw_ceil and (4 * c * t * itemsize) <= 16 * _MiB:
            return t
    return 128


# ---------------------------------------------------------------------------
# Fused GeM sum-of-cubes kernel (the heavy, HBM-bound part of the head)
# ---------------------------------------------------------------------------
def _gem_sumcubes_kernel(x_ref, o_ref, acc_ref, *, eps, hw, tile_hw,
                         tiles_per_split, c_chunk, n_chunks, need_mask, unroll):
    # x_ref block:  (1, C, TILE_HW)   -- C on sublanes, HW tile on lanes
    # o_ref block:  (1, C, 1) f32     -- per-(image, split) sum of clamp(x,eps)^3
    # acc_ref:      (C, TILE_HW) f32  -- lane-dense running accumulator
    j = pl.program_id(2)

    if need_mask:
        tile_global = pl.program_id(1) * tiles_per_split + j
        lane = lax.broadcasted_iota(jnp.int32, (1, tile_hw), 1)
        valid = (tile_global * tile_hw + lane) < hw            # (1, TILE_HW) bool
    else:
        valid = None

    def _tile_update(overwrite):
        def _body(ci, carry):
            c0 = pl.multiple_of(ci * c_chunk, c_chunk)
            xb = x_ref[0, pl.ds(c0, c_chunk), :].astype(jnp.float32)
            xb = jnp.maximum(xb, eps)                          # clamp(min=eps)
            xb3 = xb * xb * xb
            if valid is not None:
                xb3 = jnp.where(valid, xb3, 0.0)               # masked HW tail
            if overwrite:
                acc_ref[pl.ds(c0, c_chunk), :] = xb3           # first tile: no init pass
            else:
                acc_ref[pl.ds(c0, c_chunk), :] += xb3          # pure VPU, lane-dense
            return carry

        lax.fori_loop(0, n_chunks, _body, 0, unroll=unroll)

    @pl.when(j == 0)
    def _first_tile():
        _tile_update(overwrite=True)

    @pl.when(j > 0)
    def _other_tiles():
        _tile_update(overwrite=False)

    @pl.when(j == pl.num_programs(2) - 1)
    def _finalize():
        # One cross-lane (XLU) reduce per (image, split); the cbrt / L2N / permute
        # epilogue runs on the tiny (N, C) result in plain JAX outside the kernel.
        def _reduce(ci, carry):
            c0 = pl.multiple_of(ci * c_chunk, c_chunk)
            o_ref[0, pl.ds(c0, c_chunk), :] = jnp.sum(
                acc_ref[pl.ds(c0, c_chunk), :], axis=-1, keepdims=True)
            return carry

        lax.fori_loop(0, n_chunks, _reduce, 0, unroll=unroll)


def retrieval_head(x, eps=1e-6):
    """GeM(p=3) pool + L2 normalize + permute(1, 0) for a feature map x: (N, C, H, W).

    Accepts f32 or bf16 feature maps; returns f32 descriptors of shape (C, N),
    matching ImageRetrievalNet.forward applied to the backbone output.
    """
    N, C, H, W = x.shape
    HW = H * W
    x3 = x.reshape(N, C, HW)
    itemsize = jnp.dtype(x.dtype).itemsize

    tile_hw = _pick_hw_tile_gem(HW, C, itemsize)
    num_tiles = -(-HW // tile_hw)
    need_mask = (HW % tile_hw) != 0

    # Split the HW accumulation across a second "parallel" grid axis when the
    # batch is too small to feed both TensorCores of a dual-core chip (v7x);
    # on single-core chips (v5e/v6e) this is just one extra cheap grid level.
    n_split = 2 if (N == 1 and num_tiles >= 2 and num_tiles % 2 == 0) else 1
    tiles_per_split = num_tiles // n_split

    c_chunk = _pick_c_chunk(C)
    n_chunks = C // c_chunk
    unroll = 2 if n_chunks % 2 == 0 else 1

    in_block = C * tile_hw * itemsize
    acc_bytes = C * tile_hw * 4
    out_block = C * 4
    vmem_limit = min(
        max(32 * _MiB, 2 * in_block + acc_bytes + 2 * out_block + 16 * _MiB),
        48 * _MiB)

    kernel = functools.partial(
        _gem_sumcubes_kernel, eps=float(eps), hw=HW, tile_hw=tile_hw,
        tiles_per_split=tiles_per_split, c_chunk=c_chunk, n_chunks=n_chunks,
        need_mask=need_mask, unroll=unroll)

    sums3 = pl.pallas_call(
        kernel,
        out_shape=jax.ShapeDtypeStruct((N * n_split, C, 1), jnp.float32),
        grid_spec=pltpu.PrefetchScalarGridSpec(
            num_scalar_prefetch=0,
            grid=(N, n_split, tiles_per_split),
            in_specs=[pl.BlockSpec(
                (1, C, tile_hw),
                lambda i, s, j: (i, 0, s * tiles_per_split + j))],
            out_specs=pl.BlockSpec(
                (1, C, 1), lambda i, s, j: (i * n_split + s, 0, 0)),
            scratch_shapes=[pltpu.VMEM((C, tile_hw), jnp.float32)],
        ),
        compiler_params=pltpu.CompilerParams(
            dimension_semantics=("parallel", "parallel", "arbitrary"),
            vmem_limit_bytes=int(vmem_limit),
        ),
    )(x3)

    # Tiny (N, C) epilogue in plain JAX (always f32): combine splits, GeM cube
    # root, L2 normalize (torch semantics: x / (||x|| + eps)), final permute(1,0).
    sums = sums3.reshape(N, n_split, C).sum(axis=1)            # (N, C) f32
    pooled = jnp.cbrt(sums * (1.0 / float(HW)))                # GeM, p = 3
    nrm = jnp.sqrt(jnp.sum(pooled * pooled, axis=1, keepdims=True))
    desc = pooled / (nrm + eps)
    return desc.T                                              # (C, N), float32


# ---------------------------------------------------------------------------
# Standalone L2N (channel-dim normalization of an NCHW tensor)
# ---------------------------------------------------------------------------
def _l2n_kernel(x_ref, o_ref, *, eps, c_chunk, n_chunks, unroll):
    # x_ref / o_ref block: (1, C, TILE_HW); fully per-lane (per-pixel) op, so
    # partial boundary tiles need no masking (out-of-range lanes are discarded).
    tile_hw = x_ref.shape[-1]

    def _ssq(ci, acc):
        c0 = pl.multiple_of(ci * c_chunk, c_chunk)
        xb = x_ref[0, pl.ds(c0, c_chunk), :].astype(jnp.float32)
        return acc + jnp.sum(xb * xb, axis=0, keepdims=True)   # (1, TILE_HW)

    ssq = lax.fori_loop(0, n_chunks, _ssq,
                        jnp.zeros((1, tile_hw), jnp.float32), unroll=unroll)

    # Hoisted reciprocal: one 1/x per lane column instead of a C x HW divide.
    inv = pl.reciprocal(jnp.sqrt(ssq) + eps, approx=False)     # (1, TILE_HW)

    def _write(ci, carry):
        c0 = pl.multiple_of(ci * c_chunk, c_chunk)
        xb = x_ref[0, pl.ds(c0, c_chunk), :].astype(jnp.float32)
        o_ref[0, pl.ds(c0, c_chunk), :] = (xb * inv).astype(o_ref.dtype)
        return carry

    lax.fori_loop(0, n_chunks, _write, 0, unroll=unroll)


def l2n(x, eps=1e-6):
    """x: (N, C, H, W). Returns x / (||x||_2 over C, keepdim + eps)."""
    N, C, H, W = x.shape
    HW = H * W
    x3 = x.reshape(N, C, HW)
    itemsize = jnp.dtype(x.dtype).itemsize

    tile_hw = _pick_hw_tile_l2n(HW, C, itemsize)
    num_tiles = -(-HW // tile_hw)
    c_chunk = _pick_c_chunk(C)
    n_chunks = C // c_chunk
    unroll = 2 if n_chunks % 2 == 0 else 1

    block_bytes = C * tile_hw * itemsize
    vmem_limit = min(max(32 * _MiB, 4 * block_bytes + 8 * _MiB), 48 * _MiB)

    kernel = functools.partial(_l2n_kernel, eps=float(eps),
                               c_chunk=c_chunk, n_chunks=n_chunks, unroll=unroll)

    out3 = pl.pallas_call(
        kernel,
        out_shape=jax.ShapeDtypeStruct((N, C, HW), x.dtype),
        grid_spec=pltpu.PrefetchScalarGridSpec(
            num_scalar_prefetch=0,
            grid=(N, num_tiles),
            in_specs=[pl.BlockSpec((1, C, tile_hw), lambda i, j: (i, 0, j))],
            out_specs=pl.BlockSpec((1, C, tile_hw), lambda i, j: (i, 0, j)),
        ),
        compiler_params=pltpu.CompilerParams(
            dimension_semantics=("parallel", "parallel"),
            vmem_limit_bytes=int(vmem_limit),
        ),
    )(x3)

    return out3.reshape(N, C, H, W)


# ---------------------------------------------------------------------------
# Self-test
# ---------------------------------------------------------------------------
if __name__ == "__main__":
    eps = 1e-6

    # --- small shape consistent with the module head: N=2, C=4, 16x16 spatial ---
    x = jax.random.normal(jax.random.PRNGKey(0), (2, 4, 16, 16), dtype=jnp.float32)

    desc = jax.block_until_ready(retrieval_head(x, eps=eps))
    pooled_ref = jnp.mean(jnp.maximum(x, eps) ** 3, axis=(2, 3)) ** (1.0 / 3.0)
    nrm_ref = jnp.sqrt(jnp.sum(pooled_ref * pooled_ref, axis=1, keepdims=True))
    desc_ref = (pooled_ref / (nrm_ref + eps)).T                 # (C, N)
    assert desc.shape == desc_ref.shape, "descriptor shape mismatch"
    assert desc.dtype == jnp.float32, "descriptor dtype must be float32"
    assert jnp.allclose(desc, desc_ref, atol=1e-4, rtol=1e-4), \
        "GeM+L2N head mismatch vs reference"

    y = jax.block_until_ready(l2n(x, eps=eps))
    y_ref = x / (jnp.sqrt(jnp.sum(x * x, axis=1, keepdims=True)) + eps)
    assert jnp.allclose(y, y_ref, atol=1e-5, rtol=1e-5), "L2N mismatch vs reference"

    # --- exercises production paths: multi-chunk C, masked HW tail (18x18=324),
    # --- N=1 dual-core HW split, bf16 input with f32 descriptors ---
    x2 = jax.random.normal(jax.random.PRNGKey(1), (1, 256, 18, 18), dtype=jnp.float32)

    desc2 = jax.block_until_ready(retrieval_head(x2, eps=eps))
    pooled2 = jnp.mean(jnp.maximum(x2, eps) ** 3, axis=(2, 3)) ** (1.0 / 3.0)
    nrm2 = jnp.sqrt(jnp.sum(pooled2 * pooled2, axis=1, keepdims=True))
    desc2_ref = (pooled2 / (nrm2 + eps)).T
    assert jnp.allclose(desc2, desc2_ref, atol=1e-4, rtol=1e-4), \
        "GeM+L2N head mismatch (masked tail / split path)"

    x2_bf16 = x2.astype(jnp.bfloat16)
    desc2_bf = jax.block_until_ready(retrieval_head(x2_bf16, eps=eps))
    x2_up = x2_bf16.astype(jnp.float32)
    pooled_bf = jnp.mean(jnp.maximum(x2_up, eps) ** 3, axis=(2, 3)) ** (1.0 / 3.0)
    nrm_bf = jnp.sqrt(jnp.sum(pooled_bf * pooled_bf, axis=1, keepdims=True))
    desc_bf_ref = (pooled_bf / (nrm_bf + eps)).T
    assert desc2_bf.dtype == jnp.float32, "bf16 input must still give f32 descriptors"
    assert jnp.allclose(desc2_bf, desc_bf_ref, atol=1e-3, rtol=1e-3), \
        "GeM+L2N head mismatch (bf16 input)"

    y2 = jax.block_until_ready(l2n(x2, eps=eps))
    y2_ref = x2 / (jnp.sqrt(jnp.sum(x2 * x2, axis=1, keepdims=True)) + eps)
    assert jnp.allclose(y2, y2_ref, atol=1e-5, rtol=1e-5), "L2N mismatch (tail path)"

    print("KERNEL_OK")
</pallas_src>

<mosaic_0001>
module attributes {stable_mosaic.version = 11 : i64} {
  func.func @_gem_sumcubes_kernel(%arg0: i32, %arg1: i32, %arg2: i32, %arg3: memref<1x4x256xf32, #tpu.memory_space<vmem>>, %arg4: memref<1x4x1xf32, #tpu.memory_space<vmem>>, %arg5: memref<4x256xf32, #tpu.memory_space<vmem>>) attributes {dimension_semantics = [#tpu.dimension_semantics<parallel>, #tpu.dimension_semantics<parallel>, #tpu.dimension_semantics<arbitrary>], iteration_bounds = array<i64: 2, 1, 1>, scalar_prefetch = 0 : i64, scratch_operands = 1 : i64, tpu.core_type = #tpu.core_type<tc>, window_params = [{transform_indices = @transform_0, window_bounds = array<i64: 1, 4, 256>}, {transform_indices = @transform_1, window_bounds = array<i64: 1, 4, 1>}]} {
    %c0_i32 = arith.constant 0 : i32
    %0 = arith.cmpi eq, %arg2, %c0_i32 : i32
    %1 = arith.extui %0 : i1 to i32
    %c0_i32_0 = arith.constant 0 : i32
    %2 = arith.cmpi ne, %1, %c0_i32_0 : i32
    scf.if %2 {
      %c0_i32_5 = arith.constant 0 : i32
      %c4_i32 = arith.constant 4 : i32
      %9 = arith.muli %c0_i32_5, %c4_i32 : i32
      %10 = tpu.assume_multiple %9, 4 : i32
      %c0 = arith.constant 0 : index
      %11 = arith.index_cast %10 : i32 to index
      %c0_6 = arith.constant 0 : index
      %12 = vector.load %arg3[%c0, %11, %c0_6] : memref<1x4x256xf32, #tpu.memory_space<vmem>>, vector<1x4x256xf32>
      %13 = vector.shape_cast %12 : vector<1x4x256xf32> to vector<4x256xf32>
      %cst = arith.constant 9.99999997E-7 : f32
      %14 = vector.broadcast %cst : f32 to vector<4x256xf32>
      %15 = arith.maximumf %13, %14 : vector<4x256xf32>
      %16 = arith.mulf %15, %15 : vector<4x256xf32>
      %17 = arith.mulf %16, %15 : vector<4x256xf32>
      %18 = arith.index_cast %10 : i32 to index
      %c0_7 = arith.constant 0 : index
      %19 = vector.load %arg5[%18, %c0_7] : memref<4x256xf32, #tpu.memory_space<vmem>>, vector<4x256xf32>
      tpu.vector_store %arg5[%18, %c0_7], %17 {strides = array<i32>} : memref<4x256xf32, #tpu.memory_space<vmem>>, vector<4x256xf32>,
      %c1_i32 = arith.constant 1 : i32
    } else {
    }
    %c0_i32_1 = arith.constant 0 : i32
    %3 = arith.cmpi sgt, %arg2, %c0_i32_1 : i32
    %4 = arith.extui %3 : i1 to i32
    %c0_i32_2 = arith.constant 0 : i32
    %5 = arith.cmpi ne, %4, %c0_i32_2 : i32
    scf.if %5 {
      %c0_i32_5 = arith.constant 0 : i32
      %c4_i32 = arith.constant 4 : i32
      %9 = arith.muli %c0_i32_5, %c4_i32 : i32
      %10 = tpu.assume_multiple %9, 4 : i32
      %c0 = arith.constant 0 : index
      %11 = arith.index_cast %10 : i32 to index
      %c0_6 = arith.constant 0 : index
      %12 = vector.load %arg3[%c0, %11, %c0_6] : memref<1x4x256xf32, #tpu.memory_space<vmem>>, vector<1x4x256xf32>
      %13 = vector.shape_cast %12 : vector<1x4x256xf32> to vector<4x256xf32>
      %cst = arith.constant 9.99999997E-7 : f32
      %14 = vector.broadcast %cst : f32 to vector<4x256xf32>
      %15 = arith.maximumf %13, %14 : vector<4x256xf32>
      %16 = arith.mulf %15, %15 : vector<4x256xf32>
      %17 = arith.mulf %16, %15 : vector<4x256xf32>
      %18 = arith.index_cast %10 : i32 to index
      %c0_7 = arith.constant 0 : index
      %19 = vector.load %arg5[%18, %c0_7] : memref<4x256xf32, #tpu.memory_space<vmem>>, vector<4x256xf32>
      %20 = arith.addf %19, %17 : vector<4x256xf32>
      %21 = arith.index_cast %10 : i32 to index
      %c0_8 = arith.constant 0 : index
      %22 = vector.load %arg5[%21, %c0_8] : memref<4x256xf32, #tpu.memory_space<vmem>>, vector<4x256xf32>
      tpu.vector_store %arg5[%21, %c0_8], %20 {strides = array<i32>} : memref<4x256xf32, #tpu.memory_space<vmem>>, vector<4x256xf32>,
      %c1_i32 = arith.constant 1 : i32
    } else {
    }
    %c0_i32_3 = arith.constant 0 : i32
    %6 = arith.cmpi eq, %arg2, %c0_i32_3 : i32
    %7 = arith.extui %6 : i1 to i32
    %c0_i32_4 = arith.constant 0 : i32
    %8 = arith.cmpi ne, %7, %c0_i32_4 : i32
    scf.if %8 {
      %c0_i32_5 = arith.constant 0 : i32
      %c4_i32 = arith.constant 4 : i32
      %9 = arith.muli %c0_i32_5, %c4_i32 : i32
      %10 = tpu.assume_multiple %9, 4 : i32
      %11 = arith.index_cast %10 : i32 to index
      %c0 = arith.constant 0 : index
      %12 = vector.load %arg5[%11, %c0] : memref<4x256xf32, #tpu.memory_space<vmem>>, vector<4x256xf32>
      %cst = arith.constant dense<0.000000e+00> : vector<4xf32>
      %13 = vector.multi_reduction <add>, %12, %cst [1] : vector<4x256xf32> to vector<4xf32>
      %14 = vector.shape_cast %13 : vector<4xf32> to vector<4x1xf32>
      %c0_6 = arith.constant 0 : index
      %15 = arith.index_cast %10 : i32 to index
      %c0_7 = arith.constant 0 : index
      %16 = vector.load %arg4[%c0_6, %15, %c0_7] : memref<1x4x1xf32, #tpu.memory_space<vmem>>, vector<1x4x1xf32>
      %17 = vector.shape_cast %16 : vector<1x4x1xf32> to vector<4x1xf32>
      %18 = vector.shape_cast %14 : vector<4x1xf32> to vector<1x4x1xf32>
      tpu.vector_store %arg4[%c0_6, %15, %c0_7], %18 {strides = array<i32>} : memref<1x4x1xf32, #tpu.memory_space<vmem>>, vector<1x4x1xf32>,
      %c1_i32 = arith.constant 1 : i32
    } else {
    }
    return
  }
  func.func @transform_0(%arg0: i32, %arg1: i32, %arg2: i32) -> (i32, i32, i32) {
    %c1_i32 = arith.constant 1 : i32
    %0 = arith.muli %arg1, %c1_i32 : i32
    %1 = arith.addi %0, %arg2 : i32
    %c0_i32 = arith.constant 0 : i32
    %c0_i32_0 = arith.constant 0 : i32
    return %arg0, %c0_i32, %1 : i32, i32, i32
  }
  func.func @transform_1(%arg0: i32, %arg1: i32, %arg2: i32) -> (i32, i32, i32) {
    %c1_i32 = arith.constant 1 : i32
    %0 = arith.muli %arg0, %c1_i32 : i32
    %1 = arith.addi %0, %arg1 : i32
    %c0_i32 = arith.constant 0 : i32
    %c0_i32_0 = arith.constant 0 : i32
    %c0_i32_1 = arith.constant 0 : i32
    return %1, %c0_i32, %c0_i32_0 : i32, i32, i32
  }
}

</mosaic_0001>

<bundles_post_ra>
// kernel: tpu_custom_call.1
= control target key start
LH: loop header
LB: loop body
LE: loop exit
PB: predicated region body
PF: predicated region fallthrough
CT: control target
= control target key end

     0   :  { %6 = vsyncpa [#allocation4], 0  ;;  %s583_s0 = inlined_call_operand.hbm [shape: f32[2,4,256], index: 0, kind: input, shape index: {}]   ;;  %s584_s1 = inlined_call_operand.vmem [shape: f32[2,4,1], index: 1, kind: output, shape index: {}]  }
   0x1   :  { %8 = vsyncpa [#allocation4 + $0x1], 0  ;;  %s458_s6 = smov 0   ;;  %s460_s7 = smov 0  }
   0x2   :  { %s462_s8 = smov 0   ;;  %s464_s9 = smov 0  }
   0x3   :  { %s466_s10 = smov 0   ;;  %s468_s11 = smov 0  }
   0x4 LB: > { %s297_s12 = sadd.s32 4294967295, %s445_s11   ;;  %s33_s13 = sadd.s32 1, %s441_s10  ;;  %s445_s11 = sphi %s468_s11, %s14_s11   ;;  %s441_s10 = sphi %s466_s10, %s594_s10   ;;  %s437_s9 = sphi %s464_s9, %s593_s9   ;;  %s433_s8 = sphi %s462_s8, %s592_s8   ;;  %s429_s7 = sphi %s460_s7, %s591_s7   ;;  %s425_s6 = sphi %s458_s6, %s590_s6  }
   0x5   : > { %p35_p0 = scmp.ge.s32.totalorder %s33_s13, 2  ;;  %s44_s14 = sadd.s32 1, %s433_s8 }
   0x6   : > { %p51_p1 = scmp.ne.s32.totalorder %s433_s8, %s429_s7  ;;  %p52_p2 = scmp.eq.s32.totalorder %s445_s11, 0 }
   0x7   : > { %s596_s13 = smov (%p35_p0, %s33_s13), 0  ;;  %p57_p4 = scmp.ne.s32.totalorder %s429_s7, %s425_s6 }
   0x8   : > { %p494_p3 = por %p52_p2, %p51_p1  ;;  %s39_s16 = ssub.s32 %s441_s10, %s596_s13 }
   0x9   : > { %p58_p5 = scmp.eq.s32.totalorder %s297_s12, 0  ;;  %p42_p6 = scmp.eq.s32.totalorder %s39_s16, 0 }
   0xa   : > { %p316_p8 = scmp.lt.s32.totalorder %s445_s11, 2  ;;  %s109_s19 = sand.u32 1, %s433_s8  }
   0xb   : > { %p501_p7 = por %p58_p5, %p57_p4  ;;  %s309_s20 = sshll.u32 %s441_s10, 7 }
   0xc   : > { %s507_s18 = scalar_select %p42_p6, %s433_s8, %s44_s14  }
   0xd   : > { %s301_s21 = sshll.u32 %s109_s19, 3  ;;  %s514_s24 = scalar_lea.hbm %s583_s0, %s309_s20 }
   0xe   : > { %s113_s25 = scalar_lea.vmem [#allocation3], %s301_s21  ;;  %p518_p9 = pnand %p316_p8, %p494_p3 }
   0xf   : > { %s124_s26 = sshll.u32 %s113_s25, 4  ;;  %s110_s28 = scalar_lea.sflag [#allocation4], %s109_s19  ;;  %s522_s26 = int_to_ptr.vmem [resolvable:$true] %s124_s26 }
  0x10   : > { %s365_s29 = scalar_lea.hbm %s514_s24, 128  ;;  %p367_p13 = pneg %p518_p9 }
  0x11   : > { %p366_p12 = scmp.ne.s32.totalorder %s514_s24, %s365_s29  ;;  %s370_s3 = scalar_lea.hbm %s583_s0, 256 }
  0x12   : > { %p371_p2 = scmp.lt.u32.totalorder %s514_s24, %s583_s0  ;;  %p372_p3 = scmp.lt.u32.totalorder %s370_s3, %s365_s29 }
  0x13   : > { %p368_p0 = pnand %p367_p13, %p366_p12  ;;  %p374_p5 = scmp.lt.u32.totalorder %s365_s29, %s514_s24 }
  0x14   : > { %p373_p4 = por %p372_p3, %p371_p2 }
  0x15   : > { %p369_p1 = pneg %p368_p0 }
  0x16   : > { %p375_p6 = por %p374_p5, %p373_p4 }
  0x18   : > { %p376_p8 = pnand %p375_p6, %p369_p1 }
  0x1a   : > { %379 = shalt.err (!%p376_p8)
}
  0x1b   : > { %s380_s6 = scalar_lea.vmem %s522_s26, 128  ;;  %s447_s12 = smov [#allocation3]  }
  0x1c   : > { %p381_p12 = scmp.ne.s32.totalorder %s522_s26, %s380_s6  ;;  %s385_s14 = sshll.u32 %s447_s12, 4  ;;  %s386_s14 = int_to_ptr.vmem [resolvable:$false] %s385_s14 }
  0x1d   : > { %s387_s15 = scalar_lea.vmem %s386_s14, 256  ;;  %p388_p11 = scmp.lt.s32.totalorder %s522_s26, %s386_s14 }
  0x1e   : > { %p383_p0 = pnand %p381_p12, %p367_p13  ;;  %p389_p2 = scmp.lt.s32.totalorder %s387_s15, %s380_s6 }
  0x20   : > { %p384_p10 = pneg %p383_p0  ;;  %p390_p3 = por %p389_p2, %p388_p11 }
  0x22   : > { %p391_p4 = pnand %p390_p3, %p384_p10 }
  0x24   : > { %394 = shalt.err (!%p391_p4)
}
  0x25   : > { %315 = dma.hbm_to_vmem [thread:$0]  (!%p518_p9), %s514_s24, 128, %s522_s26, %s110_s28  }
  0x26   : > { %p588_p1 = scmp.lt.s32.totalorder %s445_s11, 3  ;;  %p589_p5 = scmp.ge.s32.totalorder %s445_s11, 1 }
  0x28   : > { %p130_p13 = pnand %p589_p5, %p588_p1 }
  0x29   : > { %s135_s16 = sand.u32 (!%p130_p13), 1, %s429_s7  }
  0x2a   : > { %133 = sbr.rel (%p130_p13) target bundleno = 205 (0xcd), region = 24  ;;  %s305_s19 = sshll.u32 (!%p130_p13), %s135_s16, 3 }
  0x2b   : > { %s136_s20 = scalar_lea.sflag (!%p130_p13), [#allocation4], %s135_s16  ;;  %s139_s21 = scalar_lea.vmem (!%p130_p13), [#allocation3], %s305_s19 }
  0x31   : > { %420 = dma.done.wait (%p501_p7), %s136_s20, 128  }
  0x32   : > { %422 = vsyncadd (%p501_p7), %s136_s20, 4294967168  ;;  %v173_v0 = vld [vmem:[%s139_s21] sm:$0xff]  ;;  %vm206_vm0 = vcmask 1043456   ;;  %p161_p9 = scmp.lt.s32.totalorder %s437_s9, 1  ;;  %vm212_vm1 = vcmask 3072  }
  0x33   : > { %v174_v1 = vmax.f32 %v173_v0, 1e-06 }
  0x34   : > { %s598_s9 = smov (!%p161_p9, %s437_s9), 1 }
  0x35   : > { %v175_v2 = vmul.f32 %v174_v1, %v174_v1  ;;  %s306_s22 = sshll.u32 %s598_s9, 2 }
  0x36   : > { %s164_s17 = scalar_lea.vmem %s584_s1, %s306_s22 }
  0x37   : > { %v176_v3 = vmul.f32 %v175_v2, %v174_v1 }
  0x39   : > { %v204_v4 = vcombine.high %v176_v3, %v176_v3  ;;  %v207_v5 = vsel %vm206_vm0, %v176_v3, 0.0 }
  0x3b   : > { %v208_v6 = vsel %vm206_vm0, %v204_v4, 0.0 }
  0x3c   : > { %v209_v7 = vadd.f32 %v208_v6, %v207_v5 }
  0x3e   : > { %210 = vadd.xlane.f32.xlu0 %v209_v7 }
  0xcb   : > { %v211_v8 = vpop.xlane.xlu0 %210 }
  0xcc   : > { %213 = vst.msk [vmem:[%s164_s17] sm:$0xf] %vm212_vm1, %v211_v8 }
  0xcd PF: > { %s14_s11 = sadd.s32 1, %s445_s11   ;;  %s590_s6 = smov %s429_s7 }
  0xce   : > { %p11_p7 = scmp.ge.s32.totalorder %s14_s11, 4   ;;  %s591_s7 = smov %s433_s8 }
  0xcf   : > { %s592_s8 = smov %s507_s18  ;;  %s593_s9 = smov %s441_s10 }
  0xd0   : > { %s594_s10 = smov %s596_s13  ;;  %13 = sbr.rel (!%p11_p7) target bundleno = 4 (0x4), region = 81 }
  0xd7   :  { %236 = vsyncpa [#allocation4], 1 }
  0xd8   :  { %238 = vsyncpa [#allocation4 + $0x1], 1 }

</bundles_post_ra>
